<compile_context>
chip_gen: v5e
topology: v5e:2x2
jax: 0.10.0
libtpu: 0.0.40
codegen_flags: <defaults>
</compile_context>

<pallas_src>
import functools

import jax
import jax.numpy as jnp
from jax import lax
from jax.experimental import pallas as pl
from jax.experimental.pallas import tpu as pltpu


def _round_up(x, m):
    return ((x + m - 1) // m) * m


# ---------------------------------------------------------------------------
# Prologue: per-class column scale  col_scale[n] = scale_factor * g[n] / ||v[n]||
# Operates on the transposed weight vT (K, N): the reduction runs over
# sublanes and the result is already a lane-dense (1, N) row vector.
# ---------------------------------------------------------------------------
def _col_scale_kernel(vt_ref, gt_ref, cs_ref, vsq_ref, *, scale_factor):
    k = pl.program_id(1)

    @pl.when(k == 0)
    def _():
        vsq_ref[...] = jnp.zeros_like(vsq_ref)

    v = vt_ref[...].astype(jnp.float32)                       # (tk, tn)
    vsq_ref[...] += jnp.sum(v * v, axis=0, keepdims=True)     # (1, tn)

    @pl.when(k == pl.num_programs(1) - 1)
    def _():
        vsq = vsq_ref[...]
        g = gt_ref[...].astype(jnp.float32)                   # (1, tn)
        # rsqrt goes to the EUP; guard padded (all-zero) columns.
        cs_ref[...] = jnp.where(vsq > 0.0,
                                scale_factor * g * lax.rsqrt(vsq),
                                0.0)


# ---------------------------------------------------------------------------
# Main kernel: tiled matmul with deferred row/column normalization.
# ---------------------------------------------------------------------------
def _dist_linear_kernel(x_ref, vt_ref, cs_ref, o_ref, acc_ref, xsq_ref):
    k = pl.program_id(2)

    @pl.when(k == 0)
    def _():
        acc_ref[...] = jnp.zeros_like(acc_ref)
        xsq_ref[...] = jnp.zeros_like(xsq_ref)

    x = x_ref[...]                                            # (tm, tk) native dtype
    xf = x.astype(jnp.float32)
    xsq_ref[...] += jnp.sum(xf * xf, axis=1, keepdims=True)   # (tm, 1) f32

    acc_ref[...] += jnp.dot(x, vt_ref[...],
                            preferred_element_type=jnp.float32)

    @pl.when(k == pl.num_programs(2) - 1)
    def _():
        # Row scale 1/(||x|| + 1e-5).  approx=False keeps full f32 accuracy;
        # flip to approx=True if ~1e-3 relative error is acceptable.
        row_scale = pl.reciprocal(jnp.sqrt(xsq_ref[...]) + 1e-5, approx=False)
        o_ref[...] = (acc_ref[...] * row_scale * cs_ref[...]).astype(o_ref.dtype)


def dist_linear(x, v, g, *, tm=None, tn=None, tk=None):
    """Pallas implementation of distLinear.forward.

    x: (B, indim)        -- input features
    v: (outdim, indim)   -- WeightNorm direction parameter (weight_v)
    g: (outdim, 1)       -- WeightNorm magnitude parameter (weight_g)
    """
    B, indim = x.shape
    outdim, indim2 = v.shape
    assert indim == indim2, "x / v feature dims disagree"
    assert g.shape == (outdim, 1), "g must be (outdim, 1)"
    scale_factor = 2.0 if outdim <= 200 else 10.0

    # Tile sizes: M a multiple of 8 sublanes, N/K multiples of 128 lanes.
    # Conservative defaults fit comfortably in VMEM on v5e/v6e/v7x.
    if tm is None:
        tm = min(256, _round_up(B, 8))
    if tn is None:
        tn = min(256, _round_up(outdim, 128))
    if tk is None:
        tk = min(512, _round_up(indim, 128))

    B_pad = _round_up(B, tm)
    N_pad = _round_up(outdim, tn)
    K_pad = _round_up(indim, tk)

    # Pre-transpose the weight so the MXU sees a standard [K, N] RHS; zero-pad
    # everything to tile boundaries (zeros are exact no-ops for both the
    # matmul and the squared-norm accumulations).
    x_p = jnp.pad(x, ((0, B_pad - B), (0, K_pad - indim)))
    vt_p = jnp.pad(jnp.transpose(v), ((0, K_pad - indim), (0, N_pad - outdim)))
    gt_p = jnp.pad(jnp.reshape(g, (1, outdim)), ((0, 0), (0, N_pad - outdim)))

    # --- prologue: column scale, computed once per weight --------------------
    col_scale = pl.pallas_call(
        functools.partial(_col_scale_kernel, scale_factor=scale_factor),
        out_shape=jax.ShapeDtypeStruct((1, N_pad), jnp.float32),
        grid_spec=pltpu.PrefetchScalarGridSpec(
            num_scalar_prefetch=0,
            grid=(N_pad // tn, K_pad // tk),
            in_specs=[
                pl.BlockSpec((tk, tn), lambda j, k: (k, j)),
                pl.BlockSpec((1, tn), lambda j, k: (0, j)),
            ],
            out_specs=pl.BlockSpec((1, tn), lambda j, k: (0, j)),
            scratch_shapes=[pltpu.VMEM((1, tn), jnp.float32)],
        ),
        compiler_params=pltpu.CompilerParams(
            dimension_semantics=("parallel", "arbitrary")),
    )(vt_p, gt_p)

    # --- main kernel: tiled matmul + deferred normalization -------------------
    itemsize = jnp.dtype(x.dtype).itemsize
    out_p = pl.pallas_call(
        _dist_linear_kernel,
        out_shape=jax.ShapeDtypeStruct((B_pad, N_pad), x.dtype),
        grid_spec=pltpu.PrefetchScalarGridSpec(
            num_scalar_prefetch=0,
            grid=(B_pad // tm, N_pad // tn, K_pad // tk),
            in_specs=[
                pl.BlockSpec((tm, tk), lambda i, j, k: (i, k)),
                pl.BlockSpec((tk, tn), lambda i, j, k: (k, j)),
                pl.BlockSpec((1, tn), lambda i, j, k: (0, j)),
            ],
            out_specs=pl.BlockSpec((tm, tn), lambda i, j, k: (i, j)),
            scratch_shapes=[
                pltpu.VMEM((tm, tn), jnp.float32),   # matmul accumulator
                pltpu.VMEM((tm, 1), jnp.float32),    # row squared-norm accum
            ],
        ),
        compiler_params=pltpu.CompilerParams(
            dimension_semantics=("parallel", "parallel", "arbitrary")),
        cost_estimate=pl.CostEstimate(
            flops=2 * B * indim * outdim,
            transcendentals=B + outdim,
            bytes_accessed=(B_pad * K_pad * itemsize
                            + K_pad * N_pad * itemsize
                            + 4 * N_pad
                            + B_pad * N_pad * itemsize),
        ),
    )(x_p, vt_p, col_scale)

    return out_p[:B, :outdim]


if __name__ == "__main__":
    key = jax.random.PRNGKey(0)
    k_x, k_v = jax.random.split(key)

    B, indim, outdim = 8, 32, 16            # outdim <= 200 -> scale_factor = 2

    x = jax.random.normal(k_x, (B, indim), dtype=jnp.float32)

    # Deterministic parameter init mirroring nn.Linear + WeightNorm split:
    # g initialized to the per-row norm of the original weight so W == weight.
    bound = 1.0 / jnp.sqrt(jnp.float32(indim))
    v = jax.random.uniform(k_v, (outdim, indim), dtype=jnp.float32,
                           minval=-bound, maxval=bound)
    g = jnp.sqrt(jnp.sum(v * v, axis=1, keepdims=True))      # (outdim, 1)

    scores = dist_linear(x, v, g)
    jax.block_until_ready(scores)

    # Pure-JAX reference (same math as the PyTorch forward).
    xn = x / (jnp.linalg.norm(x, axis=1, keepdims=True) + 1e-5)
    w = g * v / jnp.linalg.norm(v, axis=1, keepdims=True)
    ref = 2.0 * (xn @ w.T)
    assert scores.shape == (B, outdim)
    assert jnp.allclose(scores, ref, atol=1e-4, rtol=1e-4), "mismatch vs reference"

    print("KERNEL_OK")
</pallas_src>

<mosaic_0001>
module attributes {stable_mosaic.version = 11 : i64} {
  func.func @_col_scale_kernel(%arg0: i32, %arg1: i32, %arg2: memref<128x128xf32, #tpu.memory_space<vmem>>, %arg3: memref<1x128xf32, #tpu.memory_space<vmem>>, %arg4: memref<1x128xf32, #tpu.memory_space<vmem>>, %arg5: memref<1x128xf32, #tpu.memory_space<vmem>>) attributes {dimension_semantics = [#tpu.dimension_semantics<parallel>, #tpu.dimension_semantics<arbitrary>], iteration_bounds = array<i64: 1, 1>, scalar_prefetch = 0 : i64, scratch_operands = 1 : i64, tpu.core_type = #tpu.core_type<tc>, window_params = [{transform_indices = @transform_0, window_bounds = array<i64: 128, 128>}, {transform_indices = @transform_1, window_bounds = array<i64: 1, 128>}, {transform_indices = @transform_2, window_bounds = array<i64: 1, 128>}]} {
    %c0_i32 = arith.constant 0 : i32
    %0 = arith.cmpi eq, %arg1, %c0_i32 : i32
    %1 = arith.extui %0 : i1 to i32
    %c0_i32_0 = arith.constant 0 : i32
    %2 = arith.cmpi ne, %1, %c0_i32_0 : i32
    scf.if %2 {
      %cst_8 = arith.constant 0.000000e+00 : f32
      %13 = vector.broadcast %cst_8 : f32 to vector<1x128xf32>
      %c0_9 = arith.constant 0 : index
      %c0_10 = arith.constant 0 : index
      %14 = vector.load %arg5[%c0_9, %c0_10] : memref<1x128xf32, #tpu.memory_space<vmem>>, vector<1x128xf32>
      tpu.vector_store %arg5[%c0_9, %c0_10], %13 {strides = array<i32>} : memref<1x128xf32, #tpu.memory_space<vmem>>, vector<1x128xf32>,
    } else {
    }
    %c0 = arith.constant 0 : index
    %c0_1 = arith.constant 0 : index
    %3 = vector.load %arg2[%c0, %c0_1] : memref<128x128xf32, #tpu.memory_space<vmem>>, vector<128x128xf32>
    %c0_2 = arith.constant 0 : index
    %c0_3 = arith.constant 0 : index
    %4 = vector.load %arg5[%c0_2, %c0_3] : memref<1x128xf32, #tpu.memory_space<vmem>>, vector<1x128xf32>
    %5 = arith.mulf %3, %3 : vector<128x128xf32>
    %cst = arith.constant dense<0.000000e+00> : vector<128xf32>
    %6 = vector.multi_reduction <add>, %5, %cst [0] : vector<128x128xf32> to vector<128xf32>
    %7 = vector.shape_cast %6 : vector<128xf32> to vector<1x128xf32>
    %8 = arith.addf %4, %7 : vector<1x128xf32>
    %c0_4 = arith.constant 0 : index
    %c0_5 = arith.constant 0 : index
    %9 = vector.load %arg5[%c0_4, %c0_5] : memref<1x128xf32, #tpu.memory_space<vmem>>, vector<1x128xf32>
    tpu.vector_store %arg5[%c0_4, %c0_5], %8 {strides = array<i32>} : memref<1x128xf32, #tpu.memory_space<vmem>>, vector<1x128xf32>,
    %c0_i32_6 = arith.constant 0 : i32
    %10 = arith.cmpi eq, %arg1, %c0_i32_6 : i32
    %11 = arith.extui %10 : i1 to i32
    %c0_i32_7 = arith.constant 0 : i32
    %12 = arith.cmpi ne, %11, %c0_i32_7 : i32
    scf.if %12 {
      %c0_8 = arith.constant 0 : index
      %c0_9 = arith.constant 0 : index
      %13 = vector.load %arg5[%c0_8, %c0_9] : memref<1x128xf32, #tpu.memory_space<vmem>>, vector<1x128xf32>
      %c0_10 = arith.constant 0 : index
      %c0_11 = arith.constant 0 : index
      %14 = vector.load %arg3[%c0_10, %c0_11] : memref<1x128xf32, #tpu.memory_space<vmem>>, vector<1x128xf32>
      %cst_12 = arith.constant 0.000000e+00 : f32
      %15 = vector.broadcast %cst_12 : f32 to vector<1x128xf32>
      %16 = arith.cmpf ogt, %13, %15 : vector<1x128xf32>
      %cst_13 = arith.constant 2.000000e+00 : f32
      %17 = vector.broadcast %cst_13 : f32 to vector<1x128xf32>
      %18 = arith.mulf %17, %14 : vector<1x128xf32>
      %19 = math.rsqrt %13 : vector<1x128xf32>
      %20 = arith.mulf %18, %19 : vector<1x128xf32>
      %cst_14 = arith.constant 0.000000e+00 : f32
      %21 = vector.broadcast %cst_14 : f32 to vector<1x128xf32>
      %22 = arith.select %16, %20, %21 : vector<1x128xi1>, vector<1x128xf32>
      %c0_15 = arith.constant 0 : index
      %c0_16 = arith.constant 0 : index
      %23 = vector.load %arg4[%c0_15, %c0_16] : memref<1x128xf32, #tpu.memory_space<vmem>>, vector<1x128xf32>
      tpu.vector_store %arg4[%c0_15, %c0_16], %22 {strides = array<i32>} : memref<1x128xf32, #tpu.memory_space<vmem>>, vector<1x128xf32>,
    } else {
    }
    return
  }
  func.func @transform_0(%arg0: i32, %arg1: i32) -> (i32, i32) {
    %c0_i32 = arith.constant 0 : i32
    return %arg1, %arg0 : i32, i32
  }
  func.func @transform_1(%arg0: i32, %arg1: i32) -> (i32, i32) {
    %c0_i32 = arith.constant 0 : i32
    %c0_i32_0 = arith.constant 0 : i32
    return %c0_i32, %arg0 : i32, i32
  }
  func.func @transform_2(%arg0: i32, %arg1: i32) -> (i32, i32) {
    %c0_i32 = arith.constant 0 : i32
    %c0_i32_0 = arith.constant 0 : i32
    return %c0_i32, %arg0 : i32, i32
  }
}

</mosaic_0001>

<bundles_post_ra>
// kernel: tpu_custom_call.1
= control target key start
LH: loop header
LB: loop body
LE: loop exit
PB: predicated region body
PF: predicated region fallthrough
CT: control target
= control target key end

     0   :  { %7 = vsyncpa [#allocation4], 0  ;;  %s257_s0 = inlined_call_operand.hbm [shape: f32[128,128], index: 0, kind: input, shape index: {}]   ;;  %s258_s1 = inlined_call_operand.hbm [shape: f32[1,128], index: 1, kind: input, shape index: {}]   ;;  %s259_s2 = inlined_call_operand.hbm [shape: f32[1,128], index: 2, kind: output, shape index: {}]  }
   0x1   :  { %8 = vsyncpa [#allocation7], 0 }
   0x2   :  { %9 = vsyncpa [#allocation5], 0  ;;  %s14_s11 = sshll.u32 %s257_s0, 4  ;;  %s227_s12 = smov [#allocation3]   ;;  %s15_s11 = int_to_ptr.hbm [resolvable:$true] %s14_s11 }
   0x3   :  { %s16_s13 = sshll.u32 %s227_s12, 4  ;;  %s28_s16 = sshll.u32 %s258_s1, 4  ;;  %s17_s13 = int_to_ptr.vmem [resolvable:$true] %s16_s13  ;;  %s29_s16 = int_to_ptr.hbm [resolvable:$true] %s28_s16 }
   0x4   :  { %s228_s17 = smov 128   ;;  %s229_s18 = smov 8  }
   0x5   :  { %22 = dma.hbm_to_vmem [thread:$0]  %s15_s11, 2048, %s17_s13, [#allocation4], %s228_s17, %s228_s17, %s229_s18  }
   0x6   :  { %s230_s19 = smov [#allocation6]  }
   0x7   :  { %s30_s20 = sshll.u32 %s230_s19, 4  ;;  %s31_s20 = int_to_ptr.vmem [resolvable:$true] %s30_s20 }
   0x8   :  { %33 = dma.hbm_to_vmem [thread:$0]  %s29_s16, 16, %s31_s20, [#allocation7]  }
   0x9   :  { %221 = dma.done.wait [#allocation4], 2048  }
   0xa   :  { %222 = vsyncadd [#allocation4], 4294965248 }
   0xb   :  { %223 = dma.done.wait [#allocation7], 16  }
   0xc   :  { %224 = vsyncadd [#allocation7], 4294967280  ;;  %v231_v0 = vmov 0.0   ;;  %v47_v1 = vld [vmem:[#allocation3] sm:$0xff]  ;;  %v48_v2 = vld [vmem:[#allocation3 + $0x8] sm:$0xff]  ;;  %s232_s0 = smov [#allocation8]  }
   0xd   :  { %46 = vst [vmem:[#allocation2] sm:$0x1] %v231_v0  ;;  %v49_v3 = vld [vmem:[#allocation3 + $0x10] sm:$0xff]  ;;  %v50_v4 = vld [vmem:[#allocation3 + $0x18] sm:$0xff]  ;;  %v64_v5 = vmul.f32 %v47_v1, %v47_v1  ;;  %v65_v6 = vmul.f32 %v48_v2, %v48_v2  ;;  %v51_v8 = vld [vmem:[#allocation3 + $0x20] sm:$0xff]  ;;  %s128_s1 = sshll.u32 %s232_s0, 4  ;;  %s129_s1 = int_to_ptr.vmem [resolvable:$true] %s128_s1 }
   0xe   :  { %v66_v7 = vmul.f32 %v49_v3, %v49_v3  ;;  %v67_v9 = vmul.f32 %v50_v4, %v50_v4  ;;  %v52_v11 = vld [vmem:[#allocation3 + $0x28] sm:$0xff]  ;;  %v68_v12 = vmul.f32 %v51_v8, %v51_v8  ;;  %v53_v14 = vld [vmem:[#allocation3 + $0x30] sm:$0xff]  ;;  %v54_v17 = vld [vmem:[#allocation3 + $0x38] sm:$0xff]  ;;  %s130_s23 = sshll.u32 %s259_s2, 4  ;;  %s131_s23 = int_to_ptr.hbm [resolvable:$true] %s130_s23 }
   0xf   :  { %v80_v10 = vadd.f32 %v65_v6, %v64_v5  ;;  %v69_v15 = vmul.f32 %v52_v11, %v52_v11  ;;  %v70_v18 = vmul.f32 %v53_v14, %v53_v14  ;;  %v55_v20 = vld [vmem:[#allocation3 + $0x40] sm:$0xff]  ;;  %v71_v21 = vmul.f32 %v54_v17, %v54_v17  ;;  %v56_v23 = vld [vmem:[#allocation3 + $0x48] sm:$0xff]  ;;  %v57_v26 = vld [vmem:[#allocation3 + $0x50] sm:$0xff] }
  0x10   :  { %v72_v24 = vmul.f32 %v55_v20, %v55_v20  ;;  %v73_v27 = vmul.f32 %v56_v23, %v56_v23  ;;  %v58_v29 = vld [vmem:[#allocation3 + $0x58] sm:$0xff]  ;;  %v74_v30 = vmul.f32 %v57_v26, %v57_v26  ;;  %v59_v32 = vld [vmem:[#allocation3 + $0x60] sm:$0xff]  ;;  %v60_v35 = vld [vmem:[#allocation3 + $0x68] sm:$0xff] }
  0x11   :  { %v81_v13 = vadd.f32 %v80_v10, %v66_v7  ;;  %v75_v33 = vmul.f32 %v58_v29, %v58_v29  ;;  %v76_v36 = vmul.f32 %v59_v32, %v59_v32  ;;  %v61_v38 = vld [vmem:[#allocation3 + $0x70] sm:$0xff]  ;;  %v77_v39 = vmul.f32 %v60_v35, %v60_v35  ;;  %v62_v41 = vld [vmem:[#allocation3 + $0x78] sm:$0xff]  ;;  %v107_v60 = vld [vmem:[#allocation6] sm:$0x1] }
  0x12   :  { %v78_v42 = vmul.f32 %v61_v38, %v61_v38  ;;  %v79_v44 = vmul.f32 %v62_v41, %v62_v41  ;;  %v109_v63 = vmul.f32 2.0, %v107_v60 }
  0x13   :  { %v82_v16 = vadd.f32 %v81_v13, %v67_v9 }
  0x14   :  { %v63_v53 = vld [vmem:[#allocation2] sm:$0x1] }
  0x15   :  { %v83_v19 = vadd.f32 %v82_v16, %v68_v12 }
  0x17   :  { %v84_v22 = vadd.f32 %v83_v19, %v69_v15 }
  0x19   :  { %v85_v25 = vadd.f32 %v84_v22, %v70_v18 }
  0x1b   :  { %v86_v28 = vadd.f32 %v85_v25, %v71_v21 }
  0x1d   :  { %v87_v31 = vadd.f32 %v86_v28, %v72_v24 }
  0x1f   :  { %v88_v34 = vadd.f32 %v87_v31, %v73_v27 }
  0x21   :  { %v89_v37 = vadd.f32 %v88_v34, %v74_v30 }
  0x23   :  { %v90_v40 = vadd.f32 %v89_v37, %v75_v33 }
  0x25   :  { %v91_v43 = vadd.f32 %v90_v40, %v76_v36 }
  0x27   :  { %v92_v45 = vadd.f32 %v91_v43, %v77_v39 }
  0x29   :  { %v93_v46 = vadd.f32 %v92_v45, %v78_v42 }
  0x2b   :  { %v94_v47 = vadd.f32 %v93_v46, %v79_v44 }
  0x2d   :  { %v95_v48 = vrot.slane %v94_v47, 4 }
  0x2f   :  { %v96_v49 = vadd.f32 %v95_v48, %v94_v47 }
  0x31   :  { %v97_v50 = vrot.slane %v96_v49, 2 }
  0x33   :  { %v98_v51 = vadd.f32 %v97_v50, %v96_v49 }
  0x35   :  { %v99_v52 = vrot.slane %v98_v51, 1 }
  0x37   :  { %v100_v54 = vadd.f32 %v99_v52, %v98_v51 }
  0x39   :  { %v101_v55 = vadd.f32 %v100_v54, %v63_v53 }
  0x3b   :  { %102 = vst [vmem:[#allocation2] sm:$0x1] %v101_v55 }
  0x42   :  { %v106_v56 = vld [vmem:[#allocation2] sm:$0x1] }
  0x43   :  { %147 = vrsqrt.f32 %v106_v56  ;;  %vm116_vm1 = vweird.f32 %v106_v56  ;;  %vm108_vm3 = vcmp.gt.f32.partialorder %v106_v56, 0.0 }
  0x49   :  { %v148_v57 = vpop.eup %147 }
  0x4a   :  { %v111_v58 = vmul.f32 %v148_v57, %v106_v56  ;;  %vm117_vm0 = vweird.f32 %v148_v57 }
  0x4b   :  { %vm118_vm2 = vmor %vm116_vm1, %vm117_vm0 }
  0x4c   :  { %v112_v59 = vmul.f32 %v148_v57, %v111_v58 }
  0x4e   :  { %v113_v61 = vmul.f32 0.5, %v112_v59 }
  0x50   :  { %v114_v62 = vsub.f32 1.5, %v113_v61 }
  0x52   :  { %v115_v0 = vmul.f32 %v148_v57, %v114_v62 }
  0x54   :  { %v119_v1 = vsel %vm118_vm2, %v148_v57, %v115_v0 }
  0x55   :  { %v120_v2 = vmul.f32 %v119_v1, %v109_v63 }
  0x57   :  { %v121_v3 = vsel %vm108_vm3, %v120_v2, 0.0 }
  0x58   :  { %122 = vst [vmem:[#allocation8] sm:$0x1] %v121_v3 }
  0x59   :  { %133 = dma.vmem_to_hbm [thread:$0]  %s129_s1, 16, %s131_s23, [#allocation5]  }
  0x5a   :  { %225 = dma.done.wait [#allocation5], 16  }
  0x5b   :  { %226 = vsyncadd [#allocation5], 4294967280 }
  0x5c   :  { %138 = vsyncpa [#allocation4], 1 }
  0x5d   :  { %139 = vsyncpa [#allocation7], 1 }
  0x5e   :  { %140 = vsyncpa [#allocation5], 1 }

</bundles_post_ra>
